<compile_context>
chip_gen: v6e
topology: v6e:2x2x1
jax: 0.10.0
libtpu: 0.0.40
codegen_flags: <defaults>
</compile_context>

<pallas_src>
import math

import jax
import jax.numpy as jnp
from jax.experimental import pallas as pl
from jax.experimental.pallas import tpu as pltpu


_LANE = 128                              # TPU vreg lane width
_MAX_LANE_DIM = 4096                     # lane-dense last dim (multiple of 128)
_SUBLANE_MULT = 32                       # row multiple: safe for f32/bf16/int8 packing
_TARGET_BLOCK_BYTES = 2 * 1024 * 1024    # ~2 MiB per block buffer (bandwidth-sized)
_VMEM_LIMIT_BYTES = 40 * 1024 * 1024     # < 64 MiB (v7x physical), < 128 MiB (v5e/v6e)


class PallasTestInterface:
    """Pallas equivalent of torch2trt TestInterface: applies `fn` in-kernel.

    Inputs are flattened (+ zero-padded) to a lane-dense 2D layout in the
    wrapper -- free layout plumbing for elementwise fns -- so every store is an
    unmasked full-lane vst and per-grid-step overhead is amortized over ~MiB
    blocks instead of 4 KiB per-batch tiles.
    """

    def __init__(self, fn):
        self.fn = fn

    def __call__(self, *xs):
        fn = self.fn
        num_in = len(xs)

        # Elementwise interface contract: all inputs share one shape (as in the
        # torch2trt interface tests).  Broadcasting fns would mis-tile under the
        # shared flattening below.
        shape = xs[0].shape
        for x in xs:
            assert x.shape == shape, "PallasTestInterface requires equal input shapes"

        out_aval = jax.eval_shape(fn, *xs)
        assert out_aval.shape == shape, (
            "flattened tiling only supports elementwise fns (output shape == input shape)")

        total = math.prod(shape) if shape else 1
        itemsizes = [jnp.dtype(x.dtype).itemsize for x in xs]
        itemsizes.append(jnp.dtype(out_aval.dtype).itemsize)
        max_itemsize = max(itemsizes)

        # ---- choose a lane-dense 2D layout --------------------------------
        padded_to_lane = pl.cdiv(total, _LANE) * _LANE
        lane_dim = min(_MAX_LANE_DIM, padded_to_lane)      # multiple of 128
        rows = pl.cdiv(total, lane_dim)

        # Block rows: ~_TARGET_BLOCK_BYTES per buffer, multiple of 32 sublanes
        # (covers f32/bf16/int8 sublane packing), or the full row extent when small.
        tgt_rows = max(1, _TARGET_BLOCK_BYTES // (lane_dim * max_itemsize))
        if rows <= tgt_rows:
            block_rows = rows
        else:
            block_rows = max(_SUBLANE_MULT, (tgt_rows // _SUBLANE_MULT) * _SUBLANE_MULT)

        grid_rows = pl.cdiv(rows, block_rows)
        rows_padded = grid_rows * block_rows
        padded_total = rows_padded * lane_dim

        # ---- flatten + zero-pad (wrapper-side layout plumbing) -------------
        flat = []
        for x in xs:
            f = jnp.ravel(x)
            if padded_total != total:
                f = jnp.pad(f, (0, padded_total - total))
            flat.append(f.reshape(rows_padded, lane_dim))

        # ---- kernel: fn runs on VMEM tiles ---------------------------------
        def kernel(*refs):
            in_refs = refs[:num_in]
            out_ref = refs[num_in]
            out_ref[...] = fn(*[r[...] for r in in_refs]).astype(out_ref.dtype)

        blk = (block_rows, lane_dim)
        idx = lambda i: (i, 0)

        in_bytes = sum(padded_total * s for s in itemsizes[:-1])
        out_bytes = padded_total * itemsizes[-1]
        cost = pl.CostEstimate(
            flops=padded_total, transcendentals=0,
            bytes_accessed=in_bytes + out_bytes)

        out2d = pl.pallas_call(
            kernel,
            out_shape=jax.ShapeDtypeStruct((rows_padded, lane_dim), out_aval.dtype),
            grid_spec=pltpu.PrefetchScalarGridSpec(
                num_scalar_prefetch=0,
                grid=(grid_rows,),
                in_specs=[pl.BlockSpec(blk, idx) for _ in range(num_in)],
                out_specs=pl.BlockSpec(blk, idx),
            ),
            compiler_params=pltpu.CompilerParams(
                dimension_semantics=("parallel",),
                vmem_limit_bytes=_VMEM_LIMIT_BYTES,
            ),
            cost_estimate=cost,
        )(*flat)

        out = out2d.reshape(-1)
        if padded_total != total:
            out = out[:total]
        return out.reshape(out_aval.shape)


if __name__ == "__main__":
    # Representative elementwise fn for the interface test.
    fn = lambda a, b: jax.nn.relu(a + b)
    module = PallasTestInterface(fn)

    key = jax.random.PRNGKey(0)
    k1, k2, k3, k4 = jax.random.split(key, 4)

    # Small NCHW case matching the torch2trt interface test shapes.
    x = jax.random.normal(k1, (2, 4, 16, 16), dtype=jnp.float32)
    y = jax.random.normal(k2, (2, 4, 16, 16), dtype=jnp.float32)
    out = jax.block_until_ready(module(x, y))
    ref = fn(x, y)
    assert out.shape == ref.shape and out.dtype == ref.dtype
    assert jnp.allclose(out, ref, atol=1e-6, rtol=1e-6)

    # Non-128-divisible element count: exercises the zero-pad tail path.
    x2 = jax.random.normal(k3, (3, 5, 17, 19), dtype=jnp.float32)
    y2 = jax.random.normal(k4, (3, 5, 17, 19), dtype=jnp.float32)
    out2 = jax.block_until_ready(module(x2, y2))
    ref2 = fn(x2, y2)
    assert out2.shape == ref2.shape and out2.dtype == ref2.dtype
    assert jnp.allclose(out2, ref2, atol=1e-6, rtol=1e-6)

    print("KERNEL_OK")
</pallas_src>

<mosaic_0001>
module attributes {stable_mosaic.version = 11 : i64} {
  func.func @kernel(%arg0: i32, %arg1: memref<1x2048xf32, #tpu.memory_space<vmem>>, %arg2: memref<1x2048xf32, #tpu.memory_space<vmem>>, %arg3: memref<1x2048xf32, #tpu.memory_space<vmem>>) attributes {dimension_semantics = [#tpu.dimension_semantics<parallel>], iteration_bounds = array<i64: 1>, scalar_prefetch = 0 : i64, scratch_operands = 0 : i64, tpu.core_type = #tpu.core_type<tc>, window_params = [{transform_indices = @transform_0, window_bounds = array<i64: 1, 2048>}, {transform_indices = @transform_1, window_bounds = array<i64: 1, 2048>}, {transform_indices = @transform_2, window_bounds = array<i64: 1, 2048>}]} {
    %c0 = arith.constant 0 : index
    %c0_0 = arith.constant 0 : index
    %0 = vector.load %arg1[%c0, %c0_0] : memref<1x2048xf32, #tpu.memory_space<vmem>>, vector<1x2048xf32>
    %c0_1 = arith.constant 0 : index
    %c0_2 = arith.constant 0 : index
    %1 = vector.load %arg2[%c0_1, %c0_2] : memref<1x2048xf32, #tpu.memory_space<vmem>>, vector<1x2048xf32>
    %2 = arith.addf %0, %1 : vector<1x2048xf32>
    %cst = arith.constant 0.000000e+00 : f32
    %3 = vector.broadcast %cst : f32 to vector<1x2048xf32>
    %4 = arith.maximumf %2, %3 : vector<1x2048xf32>
    %c0_3 = arith.constant 0 : index
    %c0_4 = arith.constant 0 : index
    %5 = vector.load %arg3[%c0_3, %c0_4] : memref<1x2048xf32, #tpu.memory_space<vmem>>, vector<1x2048xf32>
    tpu.vector_store %arg3[%c0_3, %c0_4], %4 {strides = array<i32>} : memref<1x2048xf32, #tpu.memory_space<vmem>>, vector<1x2048xf32>,
    return
  }
  func.func @transform_0(%arg0: i32) -> (i32, i32) {
    %c0_i32 = arith.constant 0 : i32
    %c0_i32_0 = arith.constant 0 : i32
    return %arg0, %c0_i32 : i32, i32
  }
  func.func @transform_1(%arg0: i32) -> (i32, i32) {
    %c0_i32 = arith.constant 0 : i32
    %c0_i32_0 = arith.constant 0 : i32
    return %arg0, %c0_i32 : i32, i32
  }
  func.func @transform_2(%arg0: i32) -> (i32, i32) {
    %c0_i32 = arith.constant 0 : i32
    %c0_i32_0 = arith.constant 0 : i32
    return %arg0, %c0_i32 : i32, i32
  }
}

</mosaic_0001>

<bundles_post_ra>
// kernel: tpu_custom_call.1
= control target key start
LH: loop header
LB: loop body
LE: loop exit
PB: predicated region body
PF: predicated region fallthrough
CT: control target
= control target key end

     0   :  { %7 = vsyncpa [#allocation3], 0  ;;  %s158_s0 = inlined_call_operand.hbm [shape: f32[1,2048], index: 0, kind: input, shape index: {}]   ;;  %s159_s1 = inlined_call_operand.hbm [shape: f32[1,2048], index: 1, kind: input, shape index: {}]   ;;  %s160_s2 = inlined_call_operand.hbm [shape: f32[1,2048], index: 2, kind: output, shape index: {}]  }
   0x1   :  { %8 = vsyncpa [#allocation6], 0 }
   0x2   :  { %9 = vsyncpa [#allocation4], 0  ;;  %s131_s9 = smov [#allocation2]   ;;  %s132_s11 = smov [#allocation5]  }
   0x3   :  { %s16_s10 = sshll.u32 %s131_s9, 4  ;;  %s26_s12 = sshll.u32 %s132_s11, 4  ;;  %s17_s10 = int_to_ptr.vmem [resolvable:$true] %s16_s10  ;;  %s27_s12 = int_to_ptr.vmem [resolvable:$true] %s26_s12 }
   0x4   :  { %s73_s13 = scalar_lea.vmem %s17_s10, 256  ;;  %p78_p1 = scmp.lt.s32.totalorder %s17_s10, %s17_s10 }
   0x5   :  { %p74_p0 = scmp.ne.s32.totalorder %s17_s10, %s73_s13  ;;  %p79_p2 = scmp.lt.s32.totalorder %s73_s13, %s73_s13 }
   0x7   :  { %p80_p3 = por %p79_p2, %p78_p1 }
   0x9   :  { %p81_p4 = pnand %p80_p3, %p74_p0 }
   0xb   :  { %84 = shalt.err (!%p81_p4)
}
   0xc   :  { %19 = dma.hbm_to_vmem [thread:$0]  %s158_s0, 256, %s17_s10, [#allocation3]  }
   0xd   :  { %s93_s16 = scalar_lea.vmem %s27_s12, 256  ;;  %p98_p6 = scmp.lt.s32.totalorder %s27_s12, %s27_s12 }
   0xe   :  { %p94_p5 = scmp.ne.s32.totalorder %s27_s12, %s93_s16  ;;  %p99_p7 = scmp.lt.s32.totalorder %s93_s16, %s93_s16 }
  0x10   :  { %p100_p8 = por %p99_p7, %p98_p6 }
  0x12   :  { %p101_p9 = pnand %p100_p8, %p94_p5 }
  0x14   :  { %104 = shalt.err (!%p101_p9)
}
  0x15   :  { %29 = dma.hbm_to_vmem [thread:$0]  %s159_s1, 256, %s27_s12, [#allocation6]  }
  0x16   :  { %125 = dma.done.wait [#allocation3], 256  }
  0x17   :  { %126 = vsyncadd [#allocation3], 4294967040 }
  0x18   :  { %127 = dma.done.wait [#allocation6], 256  }
  0x19   :  { %128 = vsyncadd [#allocation6], 4294967040  ;;  %v36_v0 = vld [vmem:[#allocation2] sm:$0xff]  ;;  %v38_v1 = vld [vmem:[#allocation5] sm:$0xff]  ;;  %s133_s0 = smov [#allocation7]  }
  0x1a   :  { %v37_v2 = vld [vmem:[#allocation2 + $0x8] sm:$0xff]  ;;  %v40_v3 = vadd.f32 %v38_v1, %v36_v0  ;;  %v39_v4 = vld [vmem:[#allocation5 + $0x8] sm:$0xff]  ;;  %s52_s19 = sshll.u32 %s133_s0, 4  ;;  %s53_s19 = int_to_ptr.vmem [resolvable:$true] %s52_s19 }
  0x1b   :  { %v41_v5 = vadd.f32 %v39_v4, %v37_v2  ;;  %s105_s20 = scalar_lea.vmem %s53_s19, 256  ;;  %p110_p11 = scmp.lt.s32.totalorder %s53_s19, %s53_s19 }
  0x1c   :  { %v42_v6 = vmax.f32 %v40_v3, 0.0  ;;  %p106_p10 = scmp.ne.s32.totalorder %s53_s19, %s105_s20  ;;  %p111_p12 = scmp.lt.s32.totalorder %s105_s20, %s105_s20 }
  0x1d   :  { %v43_v7 = vmax.f32 %v41_v5, 0.0 }
  0x1e   :  { %44 = vst [vmem:[#allocation7] sm:$0xff] %v42_v6  ;;  %p112_p13 = por %p111_p12, %p110_p11 }
  0x1f   :  { %45 = vst [vmem:[#allocation7 + $0x8] sm:$0xff] %v43_v7 }
  0x20   :  { %p113_p0 = pnand %p112_p13, %p106_p10 }
  0x22   :  { %116 = shalt.err (!%p113_p0)
}
  0x23   :  { %55 = dma.vmem_to_hbm [thread:$0]  %s53_s19, 256, %s160_s2, [#allocation4]  }
  0x24   :  { %129 = dma.done.wait [#allocation4], 256  }
  0x25   :  { %130 = vsyncadd [#allocation4], 4294967040 }
  0x26   :  { %59 = vsyncpa [#allocation3], 1 }
  0x27   :  { %60 = vsyncpa [#allocation6], 1 }
  0x28   :  { %61 = vsyncpa [#allocation4], 1 }

</bundles_post_ra>
